<compile_context>
chip_gen: v6e
topology: v6e:2x2x1
jax: 0.10.0
libtpu: 0.0.40
codegen_flags: <defaults>
</compile_context>

<pallas_src>
import functools
import math

import numpy as np

import jax
import jax.numpy as jnp
from jax import lax
from jax.experimental import pallas as pl
from jax.experimental.pallas import tpu as pltpu


def _round_up(x, m):
    return (x + m - 1) // m * m


# ---------------------------------------------------------------------------
# Host-side static resampling grid (mirrors torchaudio.functional.phase_vocoder)
# ---------------------------------------------------------------------------

def _stretch_params(num_frames, rate):
    time_steps = np.arange(0.0, float(num_frames), float(rate), dtype=np.float32)
    idx0 = np.floor(time_steps).astype(np.int32)
    idx1 = idx0 + 1
    alphas = np.mod(time_steps, 1.0).astype(np.float32)
    return time_steps, idx0, idx1, alphas


# ---------------------------------------------------------------------------
# Kernels
# ---------------------------------------------------------------------------

def _unit_and_norm(re, im):
    """(unit(c).re, unit(c).im, |c|) with unit(0) == 1+0i (matches angle(0)==0).

    One rsqrt per element (EUP) instead of sqrt + divide; the epsilon guards
    denormal-magnitude bins from producing inf before the zero-select.
    """
    nsq = re * re + im * im
    inv = lax.rsqrt(nsq + 1e-37)
    n = nsq * inv                          # == sqrt(nsq); exactly 0 for 0 input
    nz = nsq > 0.0
    u_re = jnp.where(nz, re * inv, 1.0)
    u_im = jnp.where(nz, im * inv, 0.0)
    return u_re, u_im, n


def _stretch_complex_kernel(re0_ref, im0_ref, re1_ref, im1_ref, alpha_ref,
                            out_re_ref, out_im_ref, carry_re_ref, carry_im_ref):
    """Phase vocoder for one (t_chunk, F_pad) tile of one (batch*channel) item.

    The cumulative complex product (== exp(i*phase_acc)) is carried across the
    time-chunk grid axis in a (1, F_pad) VMEM scratch; within a chunk it is
    advanced 8 sublane rows at a time with a log-step roll/mask scan so every
    load and store is a full vreg.
    """
    chunk = pl.program_id(1)
    t_chunk, f_pad = out_re_ref.shape
    n_groups = t_chunk // 8

    row = lax.broadcasted_iota(jnp.int32, (8, f_pad), 0)

    @pl.when(chunk == 0)
    def _():
        # Seed: unit(c0[0]) == exp(i * angle(spec[..., 0])).
        ur, ui, _ = _unit_and_norm(re0_ref[0:1, :], im0_ref[0:1, :])
        carry_re_ref[...] = ur
        carry_im_ref[...] = ui

    def group(g, carry):
        c_re, c_im = carry                                   # (1, f_pad)
        sl = pl.ds(pl.multiple_of(g * 8, 8), 8)
        re0 = re0_ref[sl, :]
        im0 = im0_ref[sl, :]
        re1 = re1_ref[sl, :]
        im1 = im1_ref[sl, :]
        alpha = alpha_ref[sl, :]                             # (8, 1) lane-bcast

        u0r, u0i, n0 = _unit_and_norm(re0, im0)
        u1r, u1i, n1 = _unit_and_norm(re1, im1)
        mag = alpha * n1 + (1.0 - alpha) * n0

        # Per-output-frame rotation  u = unit(c1) * conj(unit(c0)).
        ur = u1r * u0r + u1i * u0i
        ui = u1i * u0r - u1r * u0i

        # Exclusive prefix product over the 8 sublane rows: shift by one
        # (identity into row 0), then Hillis-Steele with shifts 1, 2, 4.
        # Rolls go to the XLU, multiplies/selects to the VPU.
        xr = jnp.where(row >= 1, pltpu.roll(ur, shift=1, axis=0), 1.0)
        xi = jnp.where(row >= 1, pltpu.roll(ui, shift=1, axis=0), 0.0)
        for d in (1, 2, 4):
            sr = pltpu.roll(xr, shift=d, axis=0)
            si = pltpu.roll(xi, shift=d, axis=0)
            m = row >= d
            xr, xi = (jnp.where(m, xr * sr - xi * si, xr),
                      jnp.where(m, xr * si + xi * sr, xi))

        # Fold in the carried rotation; fuse the magnitude multiply into the
        # full-vreg stores (no separate exp/mag passes over the block).
        pr = c_re * xr - c_im * xi
        pi = c_re * xi + c_im * xr
        out_re_ref[sl, :] = mag * pr
        out_im_ref[sl, :] = mag * pi

        # carry <- carry * prod(u over these 8 rows) == p[7] * u[7],
        # renormalised to unit magnitude so f32 drift stays bounded over long
        # spectrograms (padded rows contribute the identity rotation).
        ncr = pr[7:8, :] * ur[7:8, :] - pi[7:8, :] * ui[7:8, :]
        nci = pr[7:8, :] * ui[7:8, :] + pi[7:8, :] * ur[7:8, :]
        inv = lax.rsqrt(ncr * ncr + nci * nci + 1e-37)
        return ncr * inv, nci * inv

    c_re, c_im = lax.fori_loop(0, n_groups, group,
                               (carry_re_ref[...], carry_im_ref[...]),
                               unroll=True)
    carry_re_ref[...] = c_re
    carry_im_ref[...] = c_im


def _stretch_mag_kernel(re0_ref, im0_ref, re1_ref, im1_ref, alpha_ref, out_ref):
    """return_complex=False: |polar(mag, phi)| == mag, so only the magnitude
    interpolation is needed (purely elementwise, no scan, fully parallel)."""
    re0 = re0_ref[...]
    im0 = im0_ref[...]
    re1 = re1_ref[...]
    im1 = im1_ref[...]
    n0 = jnp.sqrt(re0 * re0 + im0 * im0)
    n1 = jnp.sqrt(re1 * re1 + im1 * im1)
    alpha = alpha_ref[...]
    out_ref[...] = alpha * n1 + (1.0 - alpha) * n0


# ---------------------------------------------------------------------------
# Wrapper (lru-cached jitted graph per (shape, rate, flavour))
# ---------------------------------------------------------------------------

@functools.lru_cache(maxsize=128)
def _build_stretch_fn(shape, dtype_str, rate, return_complex, t_chunk_max):
    del dtype_str  # cache-key hygiene only; compute is always f32
    batch_shape = shape[:-2]
    F_, T = shape[-2], shape[-1]
    N = int(np.prod(batch_shape)) if batch_shape else 1

    _, idx0, idx1, alphas = _stretch_params(T, rate)
    T_out = int(idx0.shape[0])

    F_pad = _round_up(F_, 128)                       # lane-dense blocks
    t_chunk = min(_round_up(max(T_out, 1), 8), _round_up(t_chunk_max, 8))
    T_pad = _round_up(T_out, t_chunk)
    num_chunks = T_pad // t_chunk

    alpha_h = np.zeros((T_pad, 1), np.float32)
    alpha_h[:T_out, 0] = alphas
    alpha_const = jnp.asarray(alpha_h)

    data_spec = pl.BlockSpec((t_chunk, F_pad),
                             lambda n, c: (n * num_chunks + c, 0))
    alpha_spec = pl.BlockSpec((t_chunk, 1), lambda n, c: (c, 0))

    block_bytes = 6 * t_chunk * F_pad * 4
    vmem_limit = int(min(64 * 2**20, max(32 * 2**20, 4 * block_bytes)))

    def fn(spec):
        spec3 = spec.reshape((N, F_, T))
        re = jnp.real(spec3).astype(jnp.float32)
        im = jnp.imag(spec3).astype(jnp.float32)

        def prep(x):
            # (N, F, T) -> (N, T+2, F_pad): time on sublanes, freq lane-padded,
            # two zero frames appended (torchaudio pads before index_select),
            # then gather the two neighbouring input frames per output frame.
            xt = jnp.moveaxis(x, -1, -2)
            xt = jnp.pad(xt, ((0, 0), (0, 2), (0, F_pad - F_)))
            g0 = xt[:, idx0, :]
            g1 = xt[:, idx1, :]
            pad_t = ((0, 0), (0, T_pad - T_out), (0, 0))
            g0 = jnp.pad(g0, pad_t).reshape((N * T_pad, F_pad))
            g1 = jnp.pad(g1, pad_t).reshape((N * T_pad, F_pad))
            return g0, g1

        re0, re1 = prep(re)
        im0, im1 = prep(im)

        if return_complex:
            out_re, out_im = pl.pallas_call(
                _stretch_complex_kernel,
                out_shape=(jax.ShapeDtypeStruct((N * T_pad, F_pad), jnp.float32),
                           jax.ShapeDtypeStruct((N * T_pad, F_pad), jnp.float32)),
                grid_spec=pltpu.PrefetchScalarGridSpec(
                    num_scalar_prefetch=0,
                    grid=(N, num_chunks),
                    in_specs=[data_spec, data_spec, data_spec, data_spec,
                              alpha_spec],
                    out_specs=[data_spec, data_spec],
                    scratch_shapes=[pltpu.VMEM((1, F_pad), jnp.float32),
                                    pltpu.VMEM((1, F_pad), jnp.float32)],
                ),
                compiler_params=pltpu.CompilerParams(
                    dimension_semantics=("parallel", "arbitrary"),
                    vmem_limit_bytes=vmem_limit),
            )(re0, im0, re1, im1, alpha_const)
            out = lax.complex(out_re, out_im)
        else:
            out = pl.pallas_call(
                _stretch_mag_kernel,
                out_shape=jax.ShapeDtypeStruct((N * T_pad, F_pad), jnp.float32),
                grid_spec=pltpu.PrefetchScalarGridSpec(
                    num_scalar_prefetch=0,
                    grid=(N, num_chunks),
                    in_specs=[data_spec, data_spec, data_spec, data_spec,
                              alpha_spec],
                    out_specs=data_spec,
                ),
                compiler_params=pltpu.CompilerParams(
                    dimension_semantics=("parallel", "parallel"),
                    vmem_limit_bytes=vmem_limit),
            )(re0, im0, re1, im1, alpha_const)

        out = out.reshape((N, T_pad, F_pad))[:, :T_out, :F_]
        out = jnp.moveaxis(out, -1, -2)                      # (N, F, T_out)
        return out.reshape(batch_shape + (F_, T_out))

    return jax.jit(fn)


def time_stretch(spec, rate, *, return_complex, t_chunk=128):
    """Pallas phase-vocoder time stretch.  spec: complex (..., F, T)."""
    rate = float(rate)
    if rate == 1.0:
        return spec if return_complex else jnp.abs(spec)
    fn = _build_stretch_fn(tuple(spec.shape), str(spec.dtype), rate,
                           bool(return_complex), int(t_chunk))
    return fn(spec)


class RandomTimeStretch:
    """JAX/Pallas port of the PyTorch RandomTimeStretch module.

    `rate` must be a host scalar (it fixes the output length), exactly like
    torch.rand(1).item() in the original.  To bound re-tracing / recompiling
    in a training loop the drawn rate is quantized to `rate_quantization`
    steps (set None for the exact continuous draw); together with the
    lru-cached jitted graphs this yields only a handful of compiles.
    """

    def __init__(self, rate_range, return_complex, hop_length=None, n_freq=None,
                 rate_quantization=1.0 / 32.0):
        self.rate_min, self.rate_max = rate_range
        self.return_complex = return_complex
        # hop_length / n_freq are TimeStretch kwargs; the complex phase-vocoder
        # output is mathematically independent of phase_advance (the +-advance
        # and the 2*pi wrap cancel inside exp), so they are accepted for API
        # parity but unused by the kernel.
        self.hop_length = hop_length
        self.n_freq = n_freq
        self.rate_quantization = rate_quantization

    def __call__(self, spec, key):
        # rate = torch.rand(1).item() * (max - min) + min
        rate = float(jax.random.uniform(key, (), minval=self.rate_min,
                                        maxval=self.rate_max))
        if self.rate_quantization:
            q = self.rate_quantization
            rate = float(np.clip(np.round(rate / q) * q,
                                 self.rate_min, self.rate_max))
        return time_stretch(spec, rate, return_complex=self.return_complex)


# ---------------------------------------------------------------------------
# Pure-JAX reference (faithful port of torchaudio.functional.phase_vocoder)
# ---------------------------------------------------------------------------

def _phase_vocoder_ref(spec, rate, hop_length):
    if rate == 1.0:
        return spec
    F_, T = spec.shape[-2], spec.shape[-1]
    _, idx0, idx1, alphas = _stretch_params(T, rate)
    phase_advance = jnp.linspace(0.0, math.pi * hop_length, F_,
                                 dtype=jnp.float32)[:, None]        # (F, 1)
    alphas = jnp.asarray(alphas, jnp.float32)

    spec_p = jnp.pad(spec, ((0, 0),) * (spec.ndim - 1) + ((0, 2),))
    s0 = spec_p[..., idx0]
    s1 = spec_p[..., idx1]

    angle0 = jnp.angle(s0)
    angle1 = jnp.angle(s1)
    norm0 = jnp.abs(s0)
    norm1 = jnp.abs(s1)

    phase = angle1 - angle0 - phase_advance
    phase = phase - 2.0 * math.pi * jnp.round(phase / (2.0 * math.pi))
    phase = phase + phase_advance
    phase = jnp.concatenate([angle0[..., :1], phase[..., :-1]], axis=-1)
    phase_acc = jnp.cumsum(phase, axis=-1)

    mag = alphas * norm1 + (1.0 - alphas) * norm0
    return (mag * jnp.exp(1j * phase_acc)).astype(spec.dtype)


if __name__ == "__main__":
    key = jax.random.PRNGKey(0)
    k_rate, k_re, k_im = jax.random.split(key, 3)

    B, C, F_, T = 2, 4, 16, 16
    spec = (jax.random.normal(k_re, (B, C, F_, T), jnp.float32)
            + 1j * jax.random.normal(k_im, (B, C, F_, T), jnp.float32))
    spec = spec.astype(jnp.complex64)

    rate_range = (0.8, 1.25)
    hop_length = F_ - 1   # torchaudio default: n_fft // 2 with n_fft = (n_freq - 1) * 2

    # Same random rate the module would draw (before quantization).
    rate = float(jax.random.uniform(k_rate, (), minval=rate_range[0],
                                    maxval=rate_range[1]))

    ref_c = _phase_vocoder_ref(spec, rate, hop_length)

    # return_complex = True path (full phase vocoder kernel).
    out_c = jax.block_until_ready(time_stretch(spec, rate, return_complex=True))
    assert out_c.shape == ref_c.shape, (out_c.shape, ref_c.shape)
    err_c = float(jnp.max(jnp.abs(out_c - ref_c)))
    # Tolerance covers the f32 cumsum + large-angle sin/cos of the additive
    # reference vs the kernel's (mathematically identical) multiplicative path.
    assert err_c < 5e-3, err_c

    # return_complex = False path (magnitude-only kernel).
    out_m = jax.block_until_ready(time_stretch(spec, rate, return_complex=False))
    ref_m = jnp.abs(ref_c)
    assert out_m.shape == ref_m.shape, (out_m.shape, ref_m.shape)
    err_m = float(jnp.max(jnp.abs(out_m - ref_m)))
    assert err_m < 1e-4, err_m

    # Internal consistency: |complex output| must equal the magnitude output.
    err_self = float(jnp.max(jnp.abs(jnp.abs(out_c) - out_m)))
    assert err_self < 1e-4, err_self

    # Full module forward (draws + quantizes its own rate).
    module = RandomTimeStretch(rate_range, return_complex=True,
                               hop_length=hop_length, n_freq=F_)
    out_mod = jax.block_until_ready(module(spec, k_rate))
    q = module.rate_quantization
    rate_q = float(np.clip(np.round(rate / q) * q, *rate_range))
    t_exp = int(np.arange(0.0, float(T), rate_q, dtype=np.float32).shape[0])
    assert out_mod.shape == (B, C, F_, t_exp), (out_mod.shape, t_exp)

    print("KERNEL_OK")
</pallas_src>

<mosaic_0001>
module attributes {stable_mosaic.version = 11 : i64} {
  func.func @_stretch_complex_kernel(%arg0: i32, %arg1: i32, %arg2: memref<16x128xf32, #tpu.memory_space<vmem>>, %arg3: memref<16x128xf32, #tpu.memory_space<vmem>>, %arg4: memref<16x128xf32, #tpu.memory_space<vmem>>, %arg5: memref<16x128xf32, #tpu.memory_space<vmem>>, %arg6: memref<16x1xf32, #tpu.memory_space<vmem>>, %arg7: memref<16x128xf32, #tpu.memory_space<vmem>>, %arg8: memref<16x128xf32, #tpu.memory_space<vmem>>, %arg9: memref<1x128xf32, #tpu.memory_space<vmem>>, %arg10: memref<1x128xf32, #tpu.memory_space<vmem>>) attributes {dimension_semantics = [#tpu.dimension_semantics<parallel>, #tpu.dimension_semantics<arbitrary>], iteration_bounds = array<i64: 8, 1>, scalar_prefetch = 0 : i64, scratch_operands = 2 : i64, tpu.core_type = #tpu.core_type<tc>, window_params = [{transform_indices = @transform_0, window_bounds = array<i64: 16, 128>}, {transform_indices = @transform_1, window_bounds = array<i64: 16, 128>}, {transform_indices = @transform_2, window_bounds = array<i64: 16, 128>}, {transform_indices = @transform_3, window_bounds = array<i64: 16, 128>}, {transform_indices = @transform_4, window_bounds = array<i64: 16, 1>}, {transform_indices = @transform_5, window_bounds = array<i64: 16, 128>}, {transform_indices = @transform_6, window_bounds = array<i64: 16, 128>}]} {
    %0 = tpu.iota {dimensions = array<i32: 0>} : vector<8x128xi32>
    %c0_i32 = arith.constant 0 : i32
    %1 = arith.cmpi eq, %arg1, %c0_i32 : i32
    %2 = arith.extui %1 : i1 to i32
    %c0_i32_0 = arith.constant 0 : i32
    %3 = arith.cmpi ne, %2, %c0_i32_0 : i32
    scf.if %3 {
      %c0_72 = arith.constant 0 : index
      %c0_73 = arith.constant 0 : index
      %286 = vector.load %arg2[%c0_72, %c0_73] : memref<16x128xf32, #tpu.memory_space<vmem>>, vector<1x128xf32>
      %c0_74 = arith.constant 0 : index
      %c0_75 = arith.constant 0 : index
      %287 = vector.load %arg3[%c0_74, %c0_75] : memref<16x128xf32, #tpu.memory_space<vmem>>, vector<1x128xf32>
      %288 = arith.mulf %286, %286 : vector<1x128xf32>
      %289 = arith.mulf %287, %287 : vector<1x128xf32>
      %290 = arith.addf %288, %289 : vector<1x128xf32>
      %cst_76 = arith.constant 9.99999991E-38 : f32
      %291 = vector.broadcast %cst_76 : f32 to vector<1x128xf32>
      %292 = arith.addf %290, %291 : vector<1x128xf32>
      %293 = math.rsqrt %292 : vector<1x128xf32>
      %cst_77 = arith.constant 0.000000e+00 : f32
      %294 = vector.broadcast %cst_77 : f32 to vector<1x128xf32>
      %295 = arith.cmpf ogt, %290, %294 : vector<1x128xf32>
      %296 = arith.mulf %286, %293 : vector<1x128xf32>
      %cst_78 = arith.constant 1.000000e+00 : f32
      %297 = vector.broadcast %cst_78 : f32 to vector<1x128xf32>
      %298 = arith.select %295, %296, %297 : vector<1x128xi1>, vector<1x128xf32>
      %299 = arith.mulf %287, %293 : vector<1x128xf32>
      %cst_79 = arith.constant 0.000000e+00 : f32
      %300 = vector.broadcast %cst_79 : f32 to vector<1x128xf32>
      %301 = arith.select %295, %299, %300 : vector<1x128xi1>, vector<1x128xf32>
      %c0_80 = arith.constant 0 : index
      %c0_81 = arith.constant 0 : index
      %302 = vector.load %arg9[%c0_80, %c0_81] : memref<1x128xf32, #tpu.memory_space<vmem>>, vector<1x128xf32>
      tpu.vector_store %arg9[%c0_80, %c0_81], %298 {strides = array<i32>} : memref<1x128xf32, #tpu.memory_space<vmem>>, vector<1x128xf32>,
      %c0_82 = arith.constant 0 : index
      %c0_83 = arith.constant 0 : index
      %303 = vector.load %arg10[%c0_82, %c0_83] : memref<1x128xf32, #tpu.memory_space<vmem>>, vector<1x128xf32>
      tpu.vector_store %arg10[%c0_82, %c0_83], %301 {strides = array<i32>} : memref<1x128xf32, #tpu.memory_space<vmem>>, vector<1x128xf32>,
    } else {
    }
    %c0 = arith.constant 0 : index
    %c0_1 = arith.constant 0 : index
    %4 = vector.load %arg9[%c0, %c0_1] : memref<1x128xf32, #tpu.memory_space<vmem>>, vector<1x128xf32>
    %c0_2 = arith.constant 0 : index
    %c0_3 = arith.constant 0 : index
    %5 = vector.load %arg10[%c0_2, %c0_3] : memref<1x128xf32, #tpu.memory_space<vmem>>, vector<1x128xf32>
    %c0_i32_4 = arith.constant 0 : i32
    %c8_i32 = arith.constant 8 : i32
    %6 = arith.muli %c0_i32_4, %c8_i32 : i32
    %7 = tpu.assume_multiple %6, 8 : i32
    %8 = arith.index_cast %7 : i32 to index
    %c0_5 = arith.constant 0 : index
    %9 = vector.load %arg2[%8, %c0_5] : memref<16x128xf32, #tpu.memory_space<vmem>>, vector<8x128xf32>
    %10 = arith.index_cast %7 : i32 to index
    %c0_6 = arith.constant 0 : index
    %11 = vector.load %arg3[%10, %c0_6] : memref<16x128xf32, #tpu.memory_space<vmem>>, vector<8x128xf32>
    %12 = arith.index_cast %7 : i32 to index
    %c0_7 = arith.constant 0 : index
    %13 = vector.load %arg4[%12, %c0_7] : memref<16x128xf32, #tpu.memory_space<vmem>>, vector<8x128xf32>
    %14 = arith.index_cast %7 : i32 to index
    %c0_8 = arith.constant 0 : index
    %15 = vector.load %arg5[%14, %c0_8] : memref<16x128xf32, #tpu.memory_space<vmem>>, vector<8x128xf32>
    %16 = arith.index_cast %7 : i32 to index
    %c0_9 = arith.constant 0 : index
    %17 = vector.load %arg6[%16, %c0_9] : memref<16x1xf32, #tpu.memory_space<vmem>>, vector<8x1xf32>
    %18 = arith.mulf %9, %9 : vector<8x128xf32>
    %19 = arith.mulf %11, %11 : vector<8x128xf32>
    %20 = arith.addf %18, %19 : vector<8x128xf32>
    %cst = arith.constant 9.99999991E-38 : f32
    %21 = vector.broadcast %cst : f32 to vector<8x128xf32>
    %22 = arith.addf %20, %21 : vector<8x128xf32>
    %23 = math.rsqrt %22 : vector<8x128xf32>
    %24 = arith.mulf %20, %23 : vector<8x128xf32>
    %cst_10 = arith.constant 0.000000e+00 : f32
    %25 = vector.broadcast %cst_10 : f32 to vector<8x128xf32>
    %26 = arith.cmpf ogt, %20, %25 : vector<8x128xf32>
    %27 = arith.mulf %9, %23 : vector<8x128xf32>
    %cst_11 = arith.constant 1.000000e+00 : f32
    %28 = vector.broadcast %cst_11 : f32 to vector<8x128xf32>
    %29 = arith.select %26, %27, %28 : vector<8x128xi1>, vector<8x128xf32>
    %30 = arith.mulf %11, %23 : vector<8x128xf32>
    %cst_12 = arith.constant 0.000000e+00 : f32
    %31 = vector.broadcast %cst_12 : f32 to vector<8x128xf32>
    %32 = arith.select %26, %30, %31 : vector<8x128xi1>, vector<8x128xf32>
    %33 = arith.mulf %13, %13 : vector<8x128xf32>
    %34 = arith.mulf %15, %15 : vector<8x128xf32>
    %35 = arith.addf %33, %34 : vector<8x128xf32>
    %cst_13 = arith.constant 9.99999991E-38 : f32
    %36 = vector.broadcast %cst_13 : f32 to vector<8x128xf32>
    %37 = arith.addf %35, %36 : vector<8x128xf32>
    %38 = math.rsqrt %37 : vector<8x128xf32>
    %39 = arith.mulf %35, %38 : vector<8x128xf32>
    %cst_14 = arith.constant 0.000000e+00 : f32
    %40 = vector.broadcast %cst_14 : f32 to vector<8x128xf32>
    %41 = arith.cmpf ogt, %35, %40 : vector<8x128xf32>
    %42 = arith.mulf %13, %38 : vector<8x128xf32>
    %cst_15 = arith.constant 1.000000e+00 : f32
    %43 = vector.broadcast %cst_15 : f32 to vector<8x128xf32>
    %44 = arith.select %41, %42, %43 : vector<8x128xi1>, vector<8x128xf32>
    %45 = arith.mulf %15, %38 : vector<8x128xf32>
    %cst_16 = arith.constant 0.000000e+00 : f32
    %46 = vector.broadcast %cst_16 : f32 to vector<8x128xf32>
    %47 = arith.select %41, %45, %46 : vector<8x128xi1>, vector<8x128xf32>
    %48 = vector.broadcast %17 : vector<8x1xf32> to vector<8x128xf32>
    %49 = arith.mulf %48, %39 : vector<8x128xf32>
    %cst_17 = arith.constant 1.000000e+00 : f32
    %50 = vector.broadcast %cst_17 : f32 to vector<8x1xf32>
    %51 = arith.subf %50, %17 : vector<8x1xf32>
    %52 = vector.broadcast %51 : vector<8x1xf32> to vector<8x128xf32>
    %53 = arith.mulf %52, %24 : vector<8x128xf32>
    %54 = arith.addf %49, %53 : vector<8x128xf32>
    %55 = arith.mulf %44, %29 : vector<8x128xf32>
    %56 = arith.mulf %47, %32 : vector<8x128xf32>
    %57 = arith.addf %55, %56 : vector<8x128xf32>
    %58 = arith.mulf %47, %29 : vector<8x128xf32>
    %59 = arith.mulf %44, %32 : vector<8x128xf32>
    %60 = arith.subf %58, %59 : vector<8x128xf32>
    %c1_i32 = arith.constant 1 : i32
    %61 = vector.broadcast %c1_i32 : i32 to vector<8x128xi32>
    %62 = arith.cmpi sge, %0, %61 : vector<8x128xi32>
    %c1_i32_18 = arith.constant 1 : i32
    %63 = tpu.dynamic_rotate %57 by %c1_i32_18 dim 0 : vector<8x128xf32>, i32 -> vector<8x128xf32>
    %cst_19 = arith.constant 1.000000e+00 : f32
    %64 = vector.broadcast %cst_19 : f32 to vector<8x128xf32>
    %65 = arith.select %62, %63, %64 : vector<8x128xi1>, vector<8x128xf32>
    %c1_i32_20 = arith.constant 1 : i32
    %66 = vector.broadcast %c1_i32_20 : i32 to vector<8x128xi32>
    %67 = arith.cmpi sge, %0, %66 : vector<8x128xi32>
    %c1_i32_21 = arith.constant 1 : i32
    %68 = tpu.dynamic_rotate %60 by %c1_i32_21 dim 0 : vector<8x128xf32>, i32 -> vector<8x128xf32>
    %cst_22 = arith.constant 0.000000e+00 : f32
    %69 = vector.broadcast %cst_22 : f32 to vector<8x128xf32>
    %70 = arith.select %67, %68, %69 : vector<8x128xi1>, vector<8x128xf32>
    %c1_i32_23 = arith.constant 1 : i32
    %71 = tpu.dynamic_rotate %65 by %c1_i32_23 dim 0 : vector<8x128xf32>, i32 -> vector<8x128xf32>
    %c1_i32_24 = arith.constant 1 : i32
    %72 = tpu.dynamic_rotate %70 by %c1_i32_24 dim 0 : vector<8x128xf32>, i32 -> vector<8x128xf32>
    %c1_i32_25 = arith.constant 1 : i32
    %73 = vector.broadcast %c1_i32_25 : i32 to vector<8x128xi32>
    %74 = arith.cmpi sge, %0, %73 : vector<8x128xi32>
    %75 = arith.mulf %65, %71 : vector<8x128xf32>
    %76 = arith.mulf %70, %72 : vector<8x128xf32>
    %77 = arith.subf %75, %76 : vector<8x128xf32>
    %78 = arith.select %74, %77, %65 : vector<8x128xi1>, vector<8x128xf32>
    %79 = arith.mulf %65, %72 : vector<8x128xf32>
    %80 = arith.mulf %70, %71 : vector<8x128xf32>
    %81 = arith.addf %79, %80 : vector<8x128xf32>
    %82 = arith.select %74, %81, %70 : vector<8x128xi1>, vector<8x128xf32>
    %c2_i32 = arith.constant 2 : i32
    %83 = tpu.dynamic_rotate %78 by %c2_i32 dim 0 : vector<8x128xf32>, i32 -> vector<8x128xf32>
    %c2_i32_26 = arith.constant 2 : i32
    %84 = tpu.dynamic_rotate %82 by %c2_i32_26 dim 0 : vector<8x128xf32>, i32 -> vector<8x128xf32>
    %c2_i32_27 = arith.constant 2 : i32
    %85 = vector.broadcast %c2_i32_27 : i32 to vector<8x128xi32>
    %86 = arith.cmpi sge, %0, %85 : vector<8x128xi32>
    %87 = arith.mulf %78, %83 : vector<8x128xf32>
    %88 = arith.mulf %82, %84 : vector<8x128xf32>
    %89 = arith.subf %87, %88 : vector<8x128xf32>
    %90 = arith.select %86, %89, %78 : vector<8x128xi1>, vector<8x128xf32>
    %91 = arith.mulf %78, %84 : vector<8x128xf32>
    %92 = arith.mulf %82, %83 : vector<8x128xf32>
    %93 = arith.addf %91, %92 : vector<8x128xf32>
    %94 = arith.select %86, %93, %82 : vector<8x128xi1>, vector<8x128xf32>
    %c4_i32 = arith.constant 4 : i32
    %95 = tpu.dynamic_rotate %90 by %c4_i32 dim 0 : vector<8x128xf32>, i32 -> vector<8x128xf32>
    %c4_i32_28 = arith.constant 4 : i32
    %96 = tpu.dynamic_rotate %94 by %c4_i32_28 dim 0 : vector<8x128xf32>, i32 -> vector<8x128xf32>
    %c4_i32_29 = arith.constant 4 : i32
    %97 = vector.broadcast %c4_i32_29 : i32 to vector<8x128xi32>
    %98 = arith.cmpi sge, %0, %97 : vector<8x128xi32>
    %99 = arith.mulf %90, %95 : vector<8x128xf32>
    %100 = arith.mulf %94, %96 : vector<8x128xf32>
    %101 = arith.subf %99, %100 : vector<8x128xf32>
    %102 = arith.select %98, %101, %90 : vector<8x128xi1>, vector<8x128xf32>
    %103 = arith.mulf %90, %96 : vector<8x128xf32>
    %104 = arith.mulf %94, %95 : vector<8x128xf32>
    %105 = arith.addf %103, %104 : vector<8x128xf32>
    %106 = arith.select %98, %105, %94 : vector<8x128xi1>, vector<8x128xf32>
    %107 = vector.broadcast %4 : vector<1x128xf32> to vector<8x128xf32>
    %108 = arith.mulf %107, %102 : vector<8x128xf32>
    %109 = vector.broadcast %5 : vector<1x128xf32> to vector<8x128xf32>
    %110 = arith.mulf %109, %106 : vector<8x128xf32>
    %111 = arith.subf %108, %110 : vector<8x128xf32>
    %112 = vector.broadcast %4 : vector<1x128xf32> to vector<8x128xf32>
    %113 = arith.mulf %112, %106 : vector<8x128xf32>
    %114 = vector.broadcast %5 : vector<1x128xf32> to vector<8x128xf32>
    %115 = arith.mulf %114, %102 : vector<8x128xf32>
    %116 = arith.addf %113, %115 : vector<8x128xf32>
    %117 = arith.mulf %54, %111 : vector<8x128xf32>
    %118 = arith.index_cast %7 : i32 to index
    %c0_30 = arith.constant 0 : index
    %119 = vector.load %arg7[%118, %c0_30] : memref<16x128xf32, #tpu.memory_space<vmem>>, vector<8x128xf32>
    tpu.vector_store %arg7[%118, %c0_30], %117 {strides = array<i32>} : memref<16x128xf32, #tpu.memory_space<vmem>>, vector<8x128xf32>,
    %120 = arith.mulf %54, %116 : vector<8x128xf32>
    %121 = arith.index_cast %7 : i32 to index
    %c0_31 = arith.constant 0 : index
    %122 = vector.load %arg8[%121, %c0_31] : memref<16x128xf32, #tpu.memory_space<vmem>>, vector<8x128xf32>
    tpu.vector_store %arg8[%121, %c0_31], %120 {strides = array<i32>} : memref<16x128xf32, #tpu.memory_space<vmem>>, vector<8x128xf32>,
    %123 = vector.extract_strided_slice %111 {offsets = [7, 0], sizes = [1, 128], strides = [1, 1]} : vector<8x128xf32> to vector<1x128xf32>
    %124 = vector.extract_strided_slice %57 {offsets = [7, 0], sizes = [1, 128], strides = [1, 1]} : vector<8x128xf32> to vector<1x128xf32>
    %125 = arith.mulf %123, %124 : vector<1x128xf32>
    %126 = vector.extract_strided_slice %116 {offsets = [7, 0], sizes = [1, 128], strides = [1, 1]} : vector<8x128xf32> to vector<1x128xf32>
    %127 = vector.extract_strided_slice %60 {offsets = [7, 0], sizes = [1, 128], strides = [1, 1]} : vector<8x128xf32> to vector<1x128xf32>
    %128 = arith.mulf %126, %127 : vector<1x128xf32>
    %129 = arith.subf %125, %128 : vector<1x128xf32>
    %130 = vector.extract_strided_slice %111 {offsets = [7, 0], sizes = [1, 128], strides = [1, 1]} : vector<8x128xf32> to vector<1x128xf32>
    %131 = vector.extract_strided_slice %60 {offsets = [7, 0], sizes = [1, 128], strides = [1, 1]} : vector<8x128xf32> to vector<1x128xf32>
    %132 = arith.mulf %130, %131 : vector<1x128xf32>
    %133 = vector.extract_strided_slice %116 {offsets = [7, 0], sizes = [1, 128], strides = [1, 1]} : vector<8x128xf32> to vector<1x128xf32>
    %134 = vector.extract_strided_slice %57 {offsets = [7, 0], sizes = [1, 128], strides = [1, 1]} : vector<8x128xf32> to vector<1x128xf32>
    %135 = arith.mulf %133, %134 : vector<1x128xf32>
    %136 = arith.addf %132, %135 : vector<1x128xf32>
    %137 = arith.mulf %129, %129 : vector<1x128xf32>
    %138 = arith.mulf %136, %136 : vector<1x128xf32>
    %139 = arith.addf %137, %138 : vector<1x128xf32>
    %cst_32 = arith.constant 9.99999991E-38 : f32
    %140 = vector.broadcast %cst_32 : f32 to vector<1x128xf32>
    %141 = arith.addf %139, %140 : vector<1x128xf32>
    %142 = math.rsqrt %141 : vector<1x128xf32>
    %143 = arith.mulf %129, %142 : vector<1x128xf32>
    %144 = arith.mulf %136, %142 : vector<1x128xf32>
    %c1_i32_33 = arith.constant 1 : i32
    %c8_i32_34 = arith.constant 8 : i32
    %145 = arith.muli %c1_i32_33, %c8_i32_34 : i32
    %146 = tpu.assume_multiple %145, 8 : i32
    %147 = arith.index_cast %146 : i32 to index
    %c0_35 = arith.constant 0 : index
    %148 = vector.load %arg2[%147, %c0_35] : memref<16x128xf32, #tpu.memory_space<vmem>>, vector<8x128xf32>
    %149 = arith.index_cast %146 : i32 to index
    %c0_36 = arith.constant 0 : index
    %150 = vector.load %arg3[%149, %c0_36] : memref<16x128xf32, #tpu.memory_space<vmem>>, vector<8x128xf32>
    %151 = arith.index_cast %146 : i32 to index
    %c0_37 = arith.constant 0 : index
    %152 = vector.load %arg4[%151, %c0_37] : memref<16x128xf32, #tpu.memory_space<vmem>>, vector<8x128xf32>
    %153 = arith.index_cast %146 : i32 to index
    %c0_38 = arith.constant 0 : index
    %154 = vector.load %arg5[%153, %c0_38] : memref<16x128xf32, #tpu.memory_space<vmem>>, vector<8x128xf32>
    %155 = arith.index_cast %146 : i32 to index
    %c0_39 = arith.constant 0 : index
    %156 = vector.load %arg6[%155, %c0_39] : memref<16x1xf32, #tpu.memory_space<vmem>>, vector<8x1xf32>
    %157 = arith.mulf %148, %148 : vector<8x128xf32>
    %158 = arith.mulf %150, %150 : vector<8x128xf32>
    %159 = arith.addf %157, %158 : vector<8x128xf32>
    %cst_40 = arith.constant 9.99999991E-38 : f32
    %160 = vector.broadcast %cst_40 : f32 to vector<8x128xf32>
    %161 = arith.addf %159, %160 : vector<8x128xf32>
    %162 = math.rsqrt %161 : vector<8x128xf32>
    %163 = arith.mulf %159, %162 : vector<8x128xf32>
    %cst_41 = arith.constant 0.000000e+00 : f32
    %164 = vector.broadcast %cst_41 : f32 to vector<8x128xf32>
    %165 = arith.cmpf ogt, %159, %164 : vector<8x128xf32>
    %166 = arith.mulf %148, %162 : vector<8x128xf32>
    %cst_42 = arith.constant 1.000000e+00 : f32
    %167 = vector.broadcast %cst_42 : f32 to vector<8x128xf32>
    %168 = arith.select %165, %166, %167 : vector<8x128xi1>, vector<8x128xf32>
    %169 = arith.mulf %150, %162 : vector<8x128xf32>
    %cst_43 = arith.constant 0.000000e+00 : f32
    %170 = vector.broadcast %cst_43 : f32 to vector<8x128xf32>
    %171 = arith.select %165, %169, %170 : vector<8x128xi1>, vector<8x128xf32>
    %172 = arith.mulf %152, %152 : vector<8x128xf32>
    %173 = arith.mulf %154, %154 : vector<8x128xf32>
    %174 = arith.addf %172, %173 : vector<8x128xf32>
    %cst_44 = arith.constant 9.99999991E-38 : f32
    %175 = vector.broadcast %cst_44 : f32 to vector<8x128xf32>
    %176 = arith.addf %174, %175 : vector<8x128xf32>
    %177 = math.rsqrt %176 : vector<8x128xf32>
    %178 = arith.mulf %174, %177 : vector<8x128xf32>
    %cst_45 = arith.constant 0.000000e+00 : f32
    %179 = vector.broadcast %cst_45 : f32 to vector<8x128xf32>
    %180 = arith.cmpf ogt, %174, %179 : vector<8x128xf32>
    %181 = arith.mulf %152, %177 : vector<8x128xf32>
    %cst_46 = arith.constant 1.000000e+00 : f32
    %182 = vector.broadcast %cst_46 : f32 to vector<8x128xf32>
    %183 = arith.select %180, %181, %182 : vector<8x128xi1>, vector<8x128xf32>
    %184 = arith.mulf %154, %177 : vector<8x128xf32>
    %cst_47 = arith.constant 0.000000e+00 : f32
    %185 = vector.broadcast %cst_47 : f32 to vector<8x128xf32>
    %186 = arith.select %180, %184, %185 : vector<8x128xi1>, vector<8x128xf32>
    %187 = vector.broadcast %156 : vector<8x1xf32> to vector<8x128xf32>
    %188 = arith.mulf %187, %178 : vector<8x128xf32>
    %cst_48 = arith.constant 1.000000e+00 : f32
    %189 = vector.broadcast %cst_48 : f32 to vector<8x1xf32>
    %190 = arith.subf %189, %156 : vector<8x1xf32>
    %191 = vector.broadcast %190 : vector<8x1xf32> to vector<8x128xf32>
    %192 = arith.mulf %191, %163 : vector<8x128xf32>
    %193 = arith.addf %188, %192 : vector<8x128xf32>
    %194 = arith.mulf %183, %168 : vector<8x128xf32>
    %195 = arith.mulf %186, %171 : vector<8x128xf32>
    %196 = arith.addf %194, %195 : vector<8x128xf32>
    %197 = arith.mulf %186, %168 : vector<8x128xf32>
    %198 = arith.mulf %183, %171 : vector<8x128xf32>
    %199 = arith.subf %197, %198 : vector<8x128xf32>
    %c1_i32_49 = arith.constant 1 : i32
    %200 = vector.broadcast %c1_i32_49 : i32 to vector<8x128xi32>
    %201 = arith.cmpi sge, %0, %200 : vector<8x128xi32>
    %c1_i32_50 = arith.constant 1 : i32
    %202 = tpu.dynamic_rotate %196 by %c1_i32_50 dim 0 : vector<8x128xf32>, i32 -> vector<8x128xf32>
    %cst_51 = arith.constant 1.000000e+00 : f32
    %203 = vector.broadcast %cst_51 : f32 to vector<8x128xf32>
    %204 = arith.select %201, %202, %203 : vector<8x128xi1>, vector<8x128xf32>
    %c1_i32_52 = arith.constant 1 : i32
    %205 = vector.broadcast %c1_i32_52 : i32 to vector<8x128xi32>
    %206 = arith.cmpi sge, %0, %205 : vector<8x128xi32>
    %c1_i32_53 = arith.constant 1 : i32
    %207 = tpu.dynamic_rotate %199 by %c1_i32_53 dim 0 : vector<8x128xf32>, i32 -> vector<8x128xf32>
    %cst_54 = arith.constant 0.000000e+00 : f32
    %208 = vector.broadcast %cst_54 : f32 to vector<8x128xf32>
    %209 = arith.select %206, %207, %208 : vector<8x128xi1>, vector<8x128xf32>
    %c1_i32_55 = arith.constant 1 : i32
    %210 = tpu.dynamic_rotate %204 by %c1_i32_55 dim 0 : vector<8x128xf32>, i32 -> vector<8x128xf32>
    %c1_i32_56 = arith.constant 1 : i32
    %211 = tpu.dynamic_rotate %209 by %c1_i32_56 dim 0 : vector<8x128xf32>, i32 -> vector<8x128xf32>
    %c1_i32_57 = arith.constant 1 : i32
    %212 = vector.broadcast %c1_i32_57 : i32 to vector<8x128xi32>
    %213 = arith.cmpi sge, %0, %212 : vector<8x128xi32>
    %214 = arith.mulf %204, %210 : vector<8x128xf32>
    %215 = arith.mulf %209, %211 : vector<8x128xf32>
    %216 = arith.subf %214, %215 : vector<8x128xf32>
    %217 = arith.select %213, %216, %204 : vector<8x128xi1>, vector<8x128xf32>
    %218 = arith.mulf %204, %211 : vector<8x128xf32>
    %219 = arith.mulf %209, %210 : vector<8x128xf32>
    %220 = arith.addf %218, %219 : vector<8x128xf32>
    %221 = arith.select %213, %220, %209 : vector<8x128xi1>, vector<8x128xf32>
    %c2_i32_58 = arith.constant 2 : i32
    %222 = tpu.dynamic_rotate %217 by %c2_i32_58 dim 0 : vector<8x128xf32>, i32 -> vector<8x128xf32>
    %c2_i32_59 = arith.constant 2 : i32
    %223 = tpu.dynamic_rotate %221 by %c2_i32_59 dim 0 : vector<8x128xf32>, i32 -> vector<8x128xf32>
    %c2_i32_60 = arith.constant 2 : i32
    %224 = vector.broadcast %c2_i32_60 : i32 to vector<8x128xi32>
    %225 = arith.cmpi sge, %0, %224 : vector<8x128xi32>
    %226 = arith.mulf %217, %222 : vector<8x128xf32>
    %227 = arith.mulf %221, %223 : vector<8x128xf32>
    %228 = arith.subf %226, %227 : vector<8x128xf32>
    %229 = arith.select %225, %228, %217 : vector<8x128xi1>, vector<8x128xf32>
    %230 = arith.mulf %217, %223 : vector<8x128xf32>
    %231 = arith.mulf %221, %222 : vector<8x128xf32>
    %232 = arith.addf %230, %231 : vector<8x128xf32>
    %233 = arith.select %225, %232, %221 : vector<8x128xi1>, vector<8x128xf32>
    %c4_i32_61 = arith.constant 4 : i32
    %234 = tpu.dynamic_rotate %229 by %c4_i32_61 dim 0 : vector<8x128xf32>, i32 -> vector<8x128xf32>
    %c4_i32_62 = arith.constant 4 : i32
    %235 = tpu.dynamic_rotate %233 by %c4_i32_62 dim 0 : vector<8x128xf32>, i32 -> vector<8x128xf32>
    %c4_i32_63 = arith.constant 4 : i32
    %236 = vector.broadcast %c4_i32_63 : i32 to vector<8x128xi32>
    %237 = arith.cmpi sge, %0, %236 : vector<8x128xi32>
    %238 = arith.mulf %229, %234 : vector<8x128xf32>
    %239 = arith.mulf %233, %235 : vector<8x128xf32>
    %240 = arith.subf %238, %239 : vector<8x128xf32>
    %241 = arith.select %237, %240, %229 : vector<8x128xi1>, vector<8x128xf32>
    %242 = arith.mulf %229, %235 : vector<8x128xf32>
    %243 = arith.mulf %233, %234 : vector<8x128xf32>
    %244 = arith.addf %242, %243 : vector<8x128xf32>
    %245 = arith.select %237, %244, %233 : vector<8x128xi1>, vector<8x128xf32>
    %246 = vector.broadcast %143 : vector<1x128xf32> to vector<8x128xf32>
    %247 = arith.mulf %246, %241 : vector<8x128xf32>
    %248 = vector.broadcast %144 : vector<1x128xf32> to vector<8x128xf32>
    %249 = arith.mulf %248, %245 : vector<8x128xf32>
    %250 = arith.subf %247, %249 : vector<8x128xf32>
    %251 = vector.broadcast %143 : vector<1x128xf32> to vector<8x128xf32>
    %252 = arith.mulf %251, %245 : vector<8x128xf32>
    %253 = vector.broadcast %144 : vector<1x128xf32> to vector<8x128xf32>
    %254 = arith.mulf %253, %241 : vector<8x128xf32>
    %255 = arith.addf %252, %254 : vector<8x128xf32>
    %256 = arith.mulf %193, %250 : vector<8x128xf32>
    %257 = arith.index_cast %146 : i32 to index
    %c0_64 = arith.constant 0 : index
    %258 = vector.load %arg7[%257, %c0_64] : memref<16x128xf32, #tpu.memory_space<vmem>>, vector<8x128xf32>
    tpu.vector_store %arg7[%257, %c0_64], %256 {strides = array<i32>} : memref<16x128xf32, #tpu.memory_space<vmem>>, vector<8x128xf32>,
    %259 = arith.mulf %193, %255 : vector<8x128xf32>
    %260 = arith.index_cast %146 : i32 to index
    %c0_65 = arith.constant 0 : index
    %261 = vector.load %arg8[%260, %c0_65] : memref<16x128xf32, #tpu.memory_space<vmem>>, vector<8x128xf32>
    tpu.vector_store %arg8[%260, %c0_65], %259 {strides = array<i32>} : memref<16x128xf32, #tpu.memory_space<vmem>>, vector<8x128xf32>,
    %262 = vector.extract_strided_slice %250 {offsets = [7, 0], sizes = [1, 128], strides = [1, 1]} : vector<8x128xf32> to vector<1x128xf32>
    %263 = vector.extract_strided_slice %196 {offsets = [7, 0], sizes = [1, 128], strides = [1, 1]} : vector<8x128xf32> to vector<1x128xf32>
    %264 = arith.mulf %262, %263 : vector<1x128xf32>
    %265 = vector.extract_strided_slice %255 {offsets = [7, 0], sizes = [1, 128], strides = [1, 1]} : vector<8x128xf32> to vector<1x128xf32>
    %266 = vector.extract_strided_slice %199 {offsets = [7, 0], sizes = [1, 128], strides = [1, 1]} : vector<8x128xf32> to vector<1x128xf32>
    %267 = arith.mulf %265, %266 : vector<1x128xf32>
    %268 = arith.subf %264, %267 : vector<1x128xf32>
    %269 = vector.extract_strided_slice %250 {offsets = [7, 0], sizes = [1, 128], strides = [1, 1]} : vector<8x128xf32> to vector<1x128xf32>
    %270 = vector.extract_strided_slice %199 {offsets = [7, 0], sizes = [1, 128], strides = [1, 1]} : vector<8x128xf32> to vector<1x128xf32>
    %271 = arith.mulf %269, %270 : vector<1x128xf32>
    %272 = vector.extract_strided_slice %255 {offsets = [7, 0], sizes = [1, 128], strides = [1, 1]} : vector<8x128xf32> to vector<1x128xf32>
    %273 = vector.extract_strided_slice %196 {offsets = [7, 0], sizes = [1, 128], strides = [1, 1]} : vector<8x128xf32> to vector<1x128xf32>
    %274 = arith.mulf %272, %273 : vector<1x128xf32>
    %275 = arith.addf %271, %274 : vector<1x128xf32>
    %276 = arith.mulf %268, %268 : vector<1x128xf32>
    %277 = arith.mulf %275, %275 : vector<1x128xf32>
    %278 = arith.addf %276, %277 : vector<1x128xf32>
    %cst_66 = arith.constant 9.99999991E-38 : f32
    %279 = vector.broadcast %cst_66 : f32 to vector<1x128xf32>
    %280 = arith.addf %278, %279 : vector<1x128xf32>
    %281 = math.rsqrt %280 : vector<1x128xf32>
    %282 = arith.mulf %268, %281 : vector<1x128xf32>
    %283 = arith.mulf %275, %281 : vector<1x128xf32>
    %c2_i32_67 = arith.constant 2 : i32
    %c0_68 = arith.constant 0 : index
    %c0_69 = arith.constant 0 : index
    %284 = vector.load %arg9[%c0_68, %c0_69] : memref<1x128xf32, #tpu.memory_space<vmem>>, vector<1x128xf32>
    tpu.vector_store %arg9[%c0_68, %c0_69], %282 {strides = array<i32>} : memref<1x128xf32, #tpu.memory_space<vmem>>, vector<1x128xf32>,
    %c0_70 = arith.constant 0 : index
    %c0_71 = arith.constant 0 : index
    %285 = vector.load %arg10[%c0_70, %c0_71] : memref<1x128xf32, #tpu.memory_space<vmem>>, vector<1x128xf32>
    tpu.vector_store %arg10[%c0_70, %c0_71], %283 {strides = array<i32>} : memref<1x128xf32, #tpu.memory_space<vmem>>, vector<1x128xf32>,
    return
  }
  func.func @transform_0(%arg0: i32, %arg1: i32) -> (i32, i32) {
    %c1_i32 = arith.constant 1 : i32
    %0 = arith.muli %arg0, %c1_i32 : i32
    %1 = arith.addi %0, %arg1 : i32
    %c0_i32 = arith.constant 0 : i32
    %c0_i32_0 = arith.constant 0 : i32
    return %1, %c0_i32 : i32, i32
  }
  func.func @transform_1(%arg0: i32, %arg1: i32) -> (i32, i32) {
    %c1_i32 = arith.constant 1 : i32
    %0 = arith.muli %arg0, %c1_i32 : i32
    %1 = arith.addi %0, %arg1 : i32
    %c0_i32 = arith.constant 0 : i32
    %c0_i32_0 = arith.constant 0 : i32
    return %1, %c0_i32 : i32, i32
  }
  func.func @transform_2(%arg0: i32, %arg1: i32) -> (i32, i32) {
    %c1_i32 = arith.constant 1 : i32
    %0 = arith.muli %arg0, %c1_i32 : i32
    %1 = arith.addi %0, %arg1 : i32
    %c0_i32 = arith.constant 0 : i32
    %c0_i32_0 = arith.constant 0 : i32
    return %1, %c0_i32 : i32, i32
  }
  func.func @transform_3(%arg0: i32, %arg1: i32) -> (i32, i32) {
    %c1_i32 = arith.constant 1 : i32
    %0 = arith.muli %arg0, %c1_i32 : i32
    %1 = arith.addi %0, %arg1 : i32
    %c0_i32 = arith.constant 0 : i32
    %c0_i32_0 = arith.constant 0 : i32
    return %1, %c0_i32 : i32, i32
  }
  func.func @transform_4(%arg0: i32, %arg1: i32) -> (i32, i32) {
    %c0_i32 = arith.constant 0 : i32
    %c0_i32_0 = arith.constant 0 : i32
    return %arg1, %c0_i32 : i32, i32
  }
  func.func @transform_5(%arg0: i32, %arg1: i32) -> (i32, i32) {
    %c1_i32 = arith.constant 1 : i32
    %0 = arith.muli %arg0, %c1_i32 : i32
    %1 = arith.addi %0, %arg1 : i32
    %c0_i32 = arith.constant 0 : i32
    %c0_i32_0 = arith.constant 0 : i32
    return %1, %c0_i32 : i32, i32
  }
  func.func @transform_6(%arg0: i32, %arg1: i32) -> (i32, i32) {
    %c1_i32 = arith.constant 1 : i32
    %0 = arith.muli %arg0, %c1_i32 : i32
    %1 = arith.addi %0, %arg1 : i32
    %c0_i32 = arith.constant 0 : i32
    %c0_i32_0 = arith.constant 0 : i32
    return %1, %c0_i32 : i32, i32
  }
}

</mosaic_0001>

<bundles_post_ra>
// kernel: custom-call.1
= control target key start
LH: loop header
LB: loop body
LE: loop exit
PB: predicated region body
PF: predicated region fallthrough
CT: control target
= control target key end

     0   :  { %s51_s0 = inlined_call_operand.hbm [shape: c64[2,4,16,16], index: 0, kind: input, shape index: {}]   ;;  %s52_s1 = inlined_call_operand.vmem [shape: f32[2,4,16,16], index: 1, kind: output, shape index: {}]  }
   0x1   :  { %s2_s8 = scalar_lea.hbm %s51_s0, 2048 }
   0x2   :  { %3 = vsyncpa [#allocation0], 0  ;;  %s4_s11 = sshll.u32 %s52_s1, 4  ;;  %s5_s11 = int_to_ptr.vmem [resolvable:$true] %s4_s11 }
   0x3   :  { %s20_s12 = scalar_lea.vmem %s5_s11, 2048  ;;  %p25_p1 = scmp.lt.s32.totalorder %s5_s11, %s5_s11 }
   0x4   :  { %p21_p0 = scmp.ne.s32.totalorder %s5_s11, %s20_s12  ;;  %p26_p2 = scmp.lt.s32.totalorder %s20_s12, %s20_s12 }
   0x6   :  { %p27_p3 = por %p26_p2, %p25_p1 }
   0x8   :  { %p28_p4 = pnand %p27_p3, %p21_p0 }
   0xa   :  { %31 = shalt.err (!%p28_p4)  }
   0xb   :  { %7 = dma.hbm_to_vmem [thread:$0]  %s2_s8, 2048, %s5_s11, [#allocation0] }
   0xc   :  { %33 = dma.done.wait [#allocation0], 2048  }
   0xd   :  { %34 = vsyncadd [#allocation0], 4294965248 }
   0xe   :  { %9 = vsyncpa [#allocation0], 1 }

// kernel: custom-call
= control target key start
LH: loop header
LB: loop body
LE: loop exit
PB: predicated region body
PF: predicated region fallthrough
CT: control target
= control target key end

     0   :  { %2 = vsyncpa [#allocation0], 0  ;;  %s47_s0 = inlined_call_operand.hbm [shape: c64[2,4,16,16], index: 0, kind: input, shape index: {}]   ;;  %s48_s1 = inlined_call_operand.vmem [shape: f32[2,4,16,16], index: 1, kind: output, shape index: {}]  }
   0x1   :  { %s3_s8 = sshll.u32 %s48_s1, 4  ;;  %s4_s8 = int_to_ptr.vmem [resolvable:$true] %s3_s8 }
   0x2   :  { %s17_s9 = scalar_lea.vmem %s4_s8, 2048  ;;  %p22_p1 = scmp.lt.s32.totalorder %s4_s8, %s4_s8 }
   0x3   :  { %p18_p0 = scmp.ne.s32.totalorder %s4_s8, %s17_s9  ;;  %p23_p2 = scmp.lt.s32.totalorder %s17_s9, %s17_s9 }
   0x5   :  { %p24_p3 = por %p23_p2, %p22_p1 }
   0x7   :  { %p25_p4 = pnand %p24_p3, %p18_p0 }
   0x9   :  { %28 = shalt.err (!%p25_p4)  }
   0xa   :  { %6 = dma.hbm_to_vmem [thread:$0]  %s47_s0, 2048, %s4_s8, [#allocation0] }
   0xb   :  { %29 = dma.done.wait [#allocation0], 2048  }
   0xc   :  { %30 = vsyncadd [#allocation0], 4294965248 }
   0xd   :  { %8 = vsyncpa [#allocation0], 1 }

// kernel: custom-call.2
= control target key start
LH: loop header
LB: loop body
LE: loop exit
PB: predicated region body
PF: predicated region fallthrough
CT: control target
= control target key end

     0   :  { %s362_s0 = inlined_call_operand.vmem [shape: f32[2,4,16,14], index: 0, kind: input, shape index: {}]   ;;  %s363_s2 = inlined_call_operand.vmem [shape: c64[2,4,16,14], index: 2, kind: output, shape index: {}]   ;;  %s364_s1 = inlined_call_operand.vmem [shape: f32[2,4,16,14], index: 1, kind: input, shape index: {}]  }
   0x1   :  { %v5_v0 = vld [vmem:[%s362_s0] sm:$0xff]  ;;  %v126_v1 = vld [vmem:[%s362_s0 + $0x8] sm:$0xff]  ;;  %v128_v2 = vld [vmem:[%s362_s0 + $0x10] sm:$0xff] }
   0x2   :  { %6 = vst [vmem:[%s363_s2] sm:$0xff] %v5_v0  ;;  %127 = vst [vmem:[%s363_s2 + $0x8] sm:$0xff] %v126_v1  ;;  %v130_v3 = vld [vmem:[%s362_s0 + $0x18] sm:$0xff]  ;;  %v132_v4 = vld [vmem:[%s362_s0 + $0x20] sm:$0xff] }
   0x3   :  { %129 = vst [vmem:[%s363_s2 + $0x10] sm:$0xff] %v128_v2  ;;  %v134_v5 = vld [vmem:[%s362_s0 + $0x28] sm:$0xff]  ;;  %131 = vst [vmem:[%s363_s2 + $0x18] sm:$0xff] %v130_v3  ;;  %v136_v6 = vld [vmem:[%s362_s0 + $0x30] sm:$0xff] }
   0x4   :  { %133 = vst [vmem:[%s363_s2 + $0x20] sm:$0xff] %v132_v4  ;;  %135 = vst [vmem:[%s363_s2 + $0x28] sm:$0xff] %v134_v5  ;;  %v138_v7 = vld [vmem:[%s362_s0 + $0x38] sm:$0xff]  ;;  %v140_v8 = vld [vmem:[%s362_s0 + $0x40] sm:$0xff] }
   0x5   :  { %137 = vst [vmem:[%s363_s2 + $0x30] sm:$0xff] %v136_v6  ;;  %139 = vst [vmem:[%s363_s2 + $0x38] sm:$0xff] %v138_v7  ;;  %v142_v9 = vld [vmem:[%s362_s0 + $0x48] sm:$0xff]  ;;  %v144_v10 = vld [vmem:[%s362_s0 + $0x50] sm:$0xff] }
   0x6   :  { %141 = vst [vmem:[%s363_s2 + $0x40] sm:$0xff] %v140_v8  ;;  %v146_v11 = vld [vmem:[%s362_s0 + $0x58] sm:$0xff]  ;;  %143 = vst [vmem:[%s363_s2 + $0x48] sm:$0xff] %v142_v9  ;;  %v148_v12 = vld [vmem:[%s362_s0 + $0x60] sm:$0xff] }
   0x7   :  { %145 = vst [vmem:[%s363_s2 + $0x50] sm:$0xff] %v144_v10  ;;  %147 = vst [vmem:[%s363_s2 + $0x58] sm:$0xff] %v146_v11  ;;  %v150_v13 = vld [vmem:[%s362_s0 + $0x68] sm:$0xff]  ;;  %v59_v14 = vld [vmem:[%s364_s1] sm:$0xff] }
   0x8   :  { %149 = vst [vmem:[%s363_s2 + $0x60] sm:$0xff] %v148_v12  ;;  %151 = vst [vmem:[%s363_s2 + $0x68] sm:$0xff] %v150_v13  ;;  %v153_v15 = vld [vmem:[%s364_s1 + $0x8] sm:$0xff]  ;;  %v155_v16 = vld [vmem:[%s364_s1 + $0x10] sm:$0xff] }
   0x9   :  { %152 = vst [vmem:[%s363_s2 + $0x70] sm:$0xff] %v59_v14  ;;  %v157_v17 = vld [vmem:[%s364_s1 + $0x18] sm:$0xff]  ;;  %154 = vst [vmem:[%s363_s2 + $0x78] sm:$0xff] %v153_v15  ;;  %v159_v18 = vld [vmem:[%s364_s1 + $0x20] sm:$0xff] }
   0xa   :  { %156 = vst [vmem:[%s363_s2 + $0x80] sm:$0xff] %v155_v16  ;;  %158 = vst [vmem:[%s363_s2 + $0x88] sm:$0xff] %v157_v17  ;;  %v161_v19 = vld [vmem:[%s364_s1 + $0x28] sm:$0xff]  ;;  %v163_v20 = vld [vmem:[%s364_s1 + $0x30] sm:$0xff] }
   0xb   :  { %160 = vst [vmem:[%s363_s2 + $0x90] sm:$0xff] %v159_v18  ;;  %162 = vst [vmem:[%s363_s2 + $0x98] sm:$0xff] %v161_v19  ;;  %v165_v21 = vld [vmem:[%s364_s1 + $0x38] sm:$0xff]  ;;  %v167_v22 = vld [vmem:[%s364_s1 + $0x40] sm:$0xff] }
   0xc   :  { %164 = vst [vmem:[%s363_s2 + $0xa0] sm:$0xff] %v163_v20  ;;  %v169_v23 = vld [vmem:[%s364_s1 + $0x48] sm:$0xff]  ;;  %166 = vst [vmem:[%s363_s2 + $0xa8] sm:$0xff] %v165_v21  ;;  %v171_v24 = vld [vmem:[%s364_s1 + $0x50] sm:$0xff] }
   0xd   :  { %168 = vst [vmem:[%s363_s2 + $0xb0] sm:$0xff] %v167_v22  ;;  %170 = vst [vmem:[%s363_s2 + $0xb8] sm:$0xff] %v169_v23  ;;  %v173_v25 = vld [vmem:[%s364_s1 + $0x58] sm:$0xff]  ;;  %v175_v26 = vld [vmem:[%s364_s1 + $0x60] sm:$0xff] }
   0xe   :  { %172 = vst [vmem:[%s363_s2 + $0xc0] sm:$0xff] %v171_v24  ;;  %174 = vst [vmem:[%s363_s2 + $0xc8] sm:$0xff] %v173_v25  ;;  %v177_v27 = vld [vmem:[%s364_s1 + $0x68] sm:$0xff] }
   0xf   :  { %176 = vst [vmem:[%s363_s2 + $0xd0] sm:$0xff] %v175_v26  ;;  %178 = vst [vmem:[%s363_s2 + $0xd8] sm:$0xff] %v177_v27 }

// kernel: fn.1
= control target key start
LH: loop header
LB: loop body
LE: loop exit
PB: predicated region body
PF: predicated region fallthrough
CT: control target
= control target key end

     0   :  { %s955_s21 = smov 0   ;;  %s957_s22 = smov 0   ;;  %s1104_s0 = inlined_call_operand.vmem [shape: f32[128,128], index: 0, kind: input, shape index: {}]   ;;  %s1105_s1 = inlined_call_operand.vmem [shape: f32[128,128], index: 1, kind: input, shape index: {}]   ;;  %s1106_s2 = inlined_call_operand.vmem [shape: f32[128,128], index: 2, kind: input, shape index: {}]   ;;  %s1107_s3 = inlined_call_operand.vmem [shape: f32[128,128], index: 3, kind: input, shape index: {}]   ;;  %s1108_s4 = inlined_call_operand.vmem [shape: f32[16,1], index: 4, kind: input, shape index: {}]   ;;  %s1109_s5 = inlined_call_operand.vmem [shape: f32[128,128], index: 5, kind: output, shape index: {0}]   ;;  %s1110_s6 = inlined_call_operand.vmem [shape: f32[128,128], index: 6, kind: output, shape index: {1}]  }
   0x1   :  { %s959_s23 = smov 0  }
   0x2 LB: > { %s29_s24 = sadd.s32 1, %s913_s22  ;;  %p830_p0 = scmp.ge.s32.totalorder %s917_s23, 1  ;;  %s917_s23 = sphi %s959_s23, %s17_s23   ;;  %s913_s22 = sphi %s957_s22, %s1112_s22   ;;  %s909_s21 = sphi %s955_s21, %s1111_s21  }
   0x3   : > { %p31_p1 = scmp.ge.s32.totalorder %s29_s24, 8  ;;  %p292_p2 = scmp.lt.s32.totalorder %s917_s23, 9 }
   0x5   : > { %s1114_s24 = smov (%p31_p1, %s29_s24), 0  ;;  %p293_p3 = pnand %p830_p0, %p292_p2 }
   0x6   : > { %s831_s29 = sshll.u32 (!%p293_p3), %s909_s21, 1 }
   0x7   : > { %296 = sbr.rel (%p293_p3) target bundleno = 150 (0x96), region = 40  ;;  %p355_p4 = scmp.lt.s32.totalorder (!%p293_p3), %s831_s29, 15 }
   0xc   : > { %v849_v0 = vld [vmem:[%s1108_s4 + $0x8] sm:$0xff]  ;;  %v433_v1 = vld [vmem:[%s1108_s4] sm:$0xff]  ;;  %v919_v2 = vmov 0   ;;  %s1116_s29 = smov (!%p355_p4, %s831_s29), 15  ;;  %v407_v35 = vlaneseq }
   0xd   : > { %880 = vset.pattern.permute.xlu1 %v919_v2  ;;  %879 = vset.pattern.permute.xlu0 %v919_v2  ;;  %v586_v3 = vsub.f32 1.0, %v849_v0  ;;  %v462_v4 = vsub.f32 1.0, %v433_v1  ;;  %s979_s30 = sshll.u32 %s1116_s29, 3 }
   0xe   : > { %582 = vperm.xlu1 %880, %v849_v0   ;;  %458 = vperm.xlu0 %879, %v433_v1   ;;  %s374_s9 = scalar_lea.vmem %s1106_s2, %s979_s30  ;;  %s382_s12 = scalar_lea.vmem %s1107_s3, %s979_s30  ;;  %v997_v37 = vshrl.u32 %v407_v35, 7 }
   0xf   : > { %v847_v5 = vld [vmem:[%s374_s9 + $0x8] sm:$0xff]  ;;  %v431_v7 = vld [vmem:[%s374_s9] sm:$0xff]  ;;  %s358_s15 = scalar_lea.vmem %s1104_s0, %s979_s30  ;;  %s366_s18 = scalar_lea.vmem %s1105_s1, %s979_s30 }
  0x10   : > { %v848_v6 = vld [vmem:[%s382_s12 + $0x8] sm:$0xff]  ;;  %v569_v8 = vmul.f32 %v847_v5, %v847_v5  ;;  %v432_v10 = vld [vmem:[%s382_s12] sm:$0xff]  ;;  %v445_v11 = vmul.f32 %v431_v7, %v431_v7  ;;  %vm476_vm5 = vcmp.ge.s32.totalorder %v997_v37, 1  ;;  %vm493_vm6 = vcmp.ge.s32.totalorder %v997_v37, 2  ;;  %s396_s21 = scalar_lea.vmem %s1109_s5, %s979_s30  ;;  %s404_s27 = scalar_lea.vmem %s1110_s6, %s979_s30 }
  0x11   : > { %v570_v9 = vmul.f32 %v848_v6, %v848_v6  ;;  %v413_v12 = vld [vmem:[%s358_s15] sm:$0x1]  ;;  %v446_v14 = vmul.f32 %v432_v10, %v432_v10  ;;  %v845_v19 = vld [vmem:[%s358_s15 + $0x8] sm:$0xff]  ;;  %vm504_vm7 = vcmp.ge.s32.totalorder %v997_v37, 4 }
  0x12   : > { %589 = vperm.xlu1 %880, %v586_v3   ;;  %465 = vperm.xlu0 %879, %v462_v4   ;;  %v414_v13 = vld [vmem:[%s366_s18] sm:$0x1]  ;;  %v415_v15 = vmul.f32 %v413_v12, %v413_v12  ;;  %v846_v23 = vld [vmem:[%s366_s18 + $0x8] sm:$0xff]  ;;  %v558_v24 = vmul.f32 %v845_v19, %v845_v19 }
  0x13   : > { %v416_v16 = vmul.f32 %v414_v13, %v414_v13  ;;  %v429_v17 = vld [vmem:[%s358_s15] sm:$0xff]  ;;  %v571_v20 = vadd.f32 %v570_v9, %v569_v8  ;;  %v447_v25 = vadd.f32 %v446_v14, %v445_v11  ;;  %v559_v27 = vmul.f32 %v846_v23, %v846_v23 }
  0x14   : > { %v430_v18 = vld [vmem:[%s366_s18] sm:$0xff]  ;;  %v434_v21 = vmul.f32 %v429_v17, %v429_v17 }
  0x15   : > { %v435_v22 = vmul.f32 %v430_v18, %v430_v18  ;;  %v417_v26 = vadd.f32 %v416_v16, %v415_v15  ;;  %v572_v28 = vadd.f32 1e-37, %v571_v20  ;;  %v448_v30 = vadd.f32 1e-37, %v447_v25 }
  0x16   : > { %v560_v33 = vadd.f32 %v559_v27, %v558_v24  ;;  %vm575_vm0 = vcmp.gt.f32.partialorder %v571_v20, 0.0  ;;  %vm451_vm1 = vcmp.gt.f32.partialorder %v447_v25, 0.0 }
  0x17   : > { %v436_v29 = vadd.f32 %v435_v22, %v434_v21  ;;  %v418_v31 = vadd.f32 1e-37, %v417_v26  ;;  %881 = vrsqrt.f32 %v572_v28  ;;  %vm420_vm2 = vcmp.gt.f32.partialorder %v417_v26, 0.0 }
  0x18   : > { %883 = vrsqrt.f32 %v448_v30  ;;  %v561_v34 = vadd.f32 1e-37, %v560_v33  ;;  %vm564_vm4 = vcmp.gt.f32.partialorder %v560_v33, 0.0 }
  0x19   : > { %v437_v32 = vadd.f32 1e-37, %v436_v29  ;;  %885 = vrsqrt.f32 %v418_v31  ;;  %vm440_vm3 = vcmp.gt.f32.partialorder %v436_v29, 0.0 }
  0x1b   : > { %887 = vrsqrt.f32 %v437_v32 }
  0x1c   : > { %889 = vrsqrt.f32 %v561_v34 }
  0x24   : > { %v882_v36 = vpop.eup %881 }
  0x25   : > { %v884_v38 = vpop.eup %883  ;;  %v999_v39 = vmul.f32 %v882_v36, %v571_v20  ;;  %v576_v40 = vmul.f32 %v882_v36, %v847_v5  ;;  %v578_v41 = vmul.f32 %v882_v36, %v848_v6 }
  0x26   : > { %v886_v42 = vpop.eup %885  ;;  %v1001_v43 = vmul.f32 %v884_v38, %v447_v25  ;;  %v452_v44 = vmul.f32 %v884_v38, %v431_v7  ;;  %v454_v45 = vmul.f32 %v884_v38, %v432_v10 }
  0x27   : > { %v577_v47 = vsel %vm575_vm0, %v576_v40, 1.0  ;;  %v579_v48 = vsel %vm575_vm0, %v578_v41, 0.0  ;;  %v421_v49 = vmul.f32 %v886_v42, %v413_v12  ;;  %v423_v50 = vmul.f32 %v886_v42, %v414_v13 }
  0x28   : > { %v888_v46 = vpop.eup %887  ;;  %v453_v52 = vsel %vm451_vm1, %v452_v44, 1.0  ;;  %v455_v53 = vsel %vm451_vm1, %v454_v45, 0.0 }
  0x29   : > { %v890_v51 = vpop.eup %889  ;;  %v441_v54 = vmul.f32 %v888_v46, %v429_v17  ;;  %v443_v55 = vmul.f32 %v888_v46, %v430_v18  ;;  %v422_v56 = vsel %vm420_vm2, %v421_v49, 1.0  ;;  %v424_v57 = vsel %vm420_vm2, %v423_v50, 0.0 }
  0x2a   : > { %v1009_v58 = vmul.f32 %v890_v51, %v560_v33  ;;  %v565_v59 = vmul.f32 %v890_v51, %v845_v19  ;;  %425 = vst [vmem:[#allocation2] sm:$0x1] %v422_v56  ;;  %426 = vst [vmem:[#allocation3] sm:$0x1] %v424_v57  ;;  %v567_v62 = vmul.f32 %v890_v51, %v846_v23 }
  0x2b   : > { %v442_v60 = vsel %vm440_vm3, %v441_v54, 1.0  ;;  %v444_v61 = vsel %vm440_vm3, %v443_v55, 0.0  ;;  %v1013_v63 = vmul.f32 %v888_v46, %v436_v29 }
  0x2c   : > { %v470_v0 = vmul.f32 %v453_v52, %v442_v60  ;;  %v471_v1 = vmul.f32 %v455_v53, %v444_v61  ;;  %v473_v2 = vmul.f32 %v455_v53, %v442_v60  ;;  %v474_v3 = vmul.f32 %v453_v52, %v444_v61 }
  0x2d   : > { %v566_v4 = vsel %vm564_vm4, %v565_v59, 1.0  ;;  %v568_v5 = vsel %vm564_vm4, %v567_v62, 0.0 }
  0x2e   : > { %v1017_v6 = vadd.f32 %v471_v1, %v470_v0  ;;  %v1019_v7 = vsub.f32 %v473_v2, %v474_v3  ;;  %v594_v8 = vmul.f32 %v577_v47, %v566_v4  ;;  %v595_v9 = vmul.f32 %v579_v48, %v568_v5 }
  0x2f   : > { %v597_v10 = vmul.f32 %v579_v48, %v566_v4  ;;  %v598_v11 = vmul.f32 %v577_v47, %v568_v5 }
  0x30   : > { %v477_v12 = vrot.slane %v1017_v6, 7  ;;  %v479_v13 = vrot.slane %v1019_v7, 7  ;;  %v1024_v14 = vadd.f32 %v595_v9, %v594_v8 }
  0x31   : > { %v1026_v15 = vsub.f32 %v597_v10, %v598_v11  ;;  %v843_v60 = vld [vmem:[#allocation2] ss:$0 sm:$0xff]  ;;  %v844_v61 = vld [vmem:[#allocation3] ss:$0 sm:$0xff] }
  0x32   : > { %v478_v16 = vsel %vm476_vm5, %v477_v12, 1.0  ;;  %v480_v17 = vsel %vm476_vm5, %v479_v13, 0.0  ;;  %v600_v20 = vrot.slane %v1024_v14, 7 }
  0x33   : > { %v481_v18 = vrot.slane %v478_v16, 7  ;;  %v482_v19 = vrot.slane %v480_v17, 7  ;;  %v602_v21 = vrot.slane %v1026_v15, 7 }
  0x34   : > { %v601_v26 = vsel %vm476_vm5, %v600_v20, 1.0 }
  0x35   : > { %v483_v22 = vmul.f32 %v481_v18, %v478_v16  ;;  %v484_v23 = vmul.f32 %v482_v19, %v480_v17  ;;  %v487_v24 = vmul.f32 %v482_v19, %v478_v16  ;;  %v488_v25 = vmul.f32 %v481_v18, %v480_v17 }
  0x36   : > { %v603_v27 = vsel %vm476_vm5, %v602_v21, 0.0  ;;  %v604_v32 = vrot.slane %v601_v26, 7 }
  0x37   : > { %v485_v28 = vsub.f32 %v483_v22, %v484_v23  ;;  %v489_v29 = vadd.f32 %v488_v25, %v487_v24  ;;  %v605_v33 = vrot.slane %v603_v27, 7 }
  0x38   : > { %v606_v42 = vmul.f32 %v604_v32, %v601_v26  ;;  %v611_v48 = vmul.f32 %v604_v32, %v603_v27 }
  0x39   : > { %v486_v30 = vsel %vm476_vm5, %v485_v28, 1.0  ;;  %v490_v31 = vsel %vm476_vm5, %v489_v29, 0.0  ;;  %v607_v44 = vmul.f32 %v605_v33, %v603_v27  ;;  %v610_v47 = vmul.f32 %v605_v33, %v601_v26 }
  0x3a   : > { %v491_v34 = vrot.slane %v486_v30, 6  ;;  %v492_v35 = vrot.slane %v490_v31, 6 }
  0x3b   : > { %v608_v53 = vsub.f32 %v606_v42, %v607_v44  ;;  %v612_v54 = vadd.f32 %v611_v48, %v610_v47  ;;  %v636_v44 = vsub.s32 7, %v997_v37 }
  0x3c   : > { %v494_v36 = vmul.f32 %v491_v34, %v486_v30  ;;  %v495_v38 = vmul.f32 %v492_v35, %v490_v31  ;;  %v498_v40 = vmul.f32 %v492_v35, %v486_v30  ;;  %v499_v41 = vmul.f32 %v491_v34, %v490_v31 }
  0x3d   : > { %v609_v1 = vsel %vm476_vm5, %v608_v53, 1.0  ;;  %v613_v4 = vsel %vm476_vm5, %v612_v54, 0.0 }
  0x3e   : > { %v496_v45 = vsub.f32 %v494_v36, %v495_v38  ;;  %v500_v46 = vadd.f32 %v499_v41, %v498_v40  ;;  %v614_v11 = vrot.slane %v609_v1, 6  ;;  %v615_v16 = vrot.slane %v613_v4, 6 }
  0x40   : > { %v497_v49 = vsel %vm493_vm6, %v496_v45, %v486_v30  ;;  %v501_v50 = vsel %vm493_vm6, %v500_v46, %v490_v31  ;;  %v616_v21 = vmul.f32 %v614_v11, %v609_v1  ;;  %v621_v22 = vmul.f32 %v614_v11, %v613_v4 }
  0x41   : > { %v502_v51 = vrot.slane %v497_v49, 4  ;;  %v503_v52 = vrot.slane %v501_v50, 4  ;;  %v617_v25 = vmul.f32 %v615_v16, %v613_v4  ;;  %v620_v26 = vmul.f32 %v615_v16, %v609_v1 }
  0x43   : > { %v505_v55 = vmul.f32 %v502_v51, %v497_v49  ;;  %v506_v56 = vmul.f32 %v503_v52, %v501_v50  ;;  %v509_v57 = vmul.f32 %v503_v52, %v497_v49  ;;  %v510_v59 = vmul.f32 %v502_v51, %v501_v50 }
  0x44   : > { %v618_v30 = vsub.f32 %v616_v21, %v617_v25  ;;  %v622_v31 = vadd.f32 %v621_v22, %v620_v26 }
  0x45   : > { %v507_v62 = vsub.f32 %v505_v55, %v506_v56  ;;  %v511_v0 = vadd.f32 %v510_v59, %v509_v57 }
  0x46   : > { %v619_v33 = vsel %vm493_vm6, %v618_v30, %v609_v1 }
  0x47   : > { %v508_v2 = vsel %vm504_vm7, %v507_v62, %v497_v49  ;;  %v512_v3 = vsel %vm504_vm7, %v511_v0, %v501_v50 }
  0x48   : > { %v519_v5 = vmul.f32 %v843_v60, %v508_v2  ;;  %v526_v8 = vmul.f32 %v844_v61, %v512_v3  ;;  %v528_v9 = vmul.f32 %v843_v60, %v512_v3  ;;  %v529_v10 = vmul.f32 %v844_v61, %v508_v2 }
  0x4a   : > { %v1056_v12 = vsub.f32 %v519_v5, %v526_v8  ;;  %v1058_v13 = vadd.f32 %v529_v10, %v528_v9 }
  0x4c   : > { %v535_v17 = vmul.f32 %v1056_v12, %v1017_v6  ;;  %v536_v18 = vmul.f32 %v1058_v13, %v1019_v7  ;;  %v538_v19 = vmul.f32 %v1056_v12, %v1019_v7  ;;  %v539_v20 = vmul.f32 %v1058_v13, %v1017_v6 }
  0x4d   : > { %v623_v7 = vsel %vm493_vm6, %v622_v31, %v613_v4  ;;  %v624_v6 = vrot.slane %v619_v33, 4 }
  0x4e   : > { %v537_v23 = vsub.f32 %v535_v17, %v536_v18  ;;  %v540_v24 = vadd.f32 %v539_v20, %v538_v19  ;;  %v625_v34 = vrot.slane %v623_v7, 4 }
  0x4f   : > { %v626_v35 = vmul.f32 %v624_v6, %v619_v33  ;;  %v631_v40 = vmul.f32 %v624_v6, %v623_v7 }
  0x50   : > { %v541_v27 = vmul.f32 %v537_v23, %v537_v23  ;;  %v542_v28 = vmul.f32 %v540_v24, %v540_v24  ;;  %v627_v36 = vmul.f32 %v625_v34, %v623_v7  ;;  %v630_v38 = vmul.f32 %v625_v34, %v619_v33 }
  0x52   : > { %v543_v29 = vadd.f32 %v542_v28, %v541_v27  ;;  %v628_v41 = vsub.f32 %v626_v35, %v627_v36  ;;  %v632_v42 = vadd.f32 %v631_v40, %v630_v38 }
  0x54   : > { %v544_v32 = vadd.f32 1e-37, %v543_v29  ;;  %v629_v48 = vsel %vm504_vm7, %v628_v41, %v619_v33  ;;  %v633_v49 = vsel %vm504_vm7, %v632_v42, %v623_v7 }
  0x56   : > { %891 = vrsqrt.f32 %v544_v32 }
  0x63   : > { %v892_v45 = vpop.eup %891 }
  0x64   : > { %v546_v46 = vmul.f32 %v892_v45, %v537_v23  ;;  %v547_v47 = vmul.f32 %v892_v45, %v540_v24 }
  0x66   : > { %v637_v50 = vrot.slane %v546_v46, %v636_v44  ;;  %v642_v51 = vrot.slane %v547_v47, %v636_v44 }
  0x68   : > { %v638_v52 = vmul.f32 %v637_v50, %v629_v48  ;;  %v643_v53 = vmul.f32 %v642_v51, %v633_v49  ;;  %v645_v54 = vmul.f32 %v637_v50, %v633_v49  ;;  %v646_v55 = vmul.f32 %v642_v51, %v629_v48 }
  0x6a   : > { %v644_v56 = vsub.f32 %v638_v52, %v643_v53  ;;  %v647_v57 = vadd.f32 %v646_v55, %v645_v54 }
  0x6c   : > { %v654_v59 = vmul.f32 %v644_v56, %v1024_v14  ;;  %v655_v60 = vmul.f32 %v647_v57, %v1026_v15  ;;  %v657_v61 = vmul.f32 %v644_v56, %v1026_v15  ;;  %v658_v62 = vmul.f32 %v647_v57, %v1024_v14 }
  0x6e   : > { %v656_v0 = vsub.f32 %v654_v59, %v655_v60  ;;  %v659_v1 = vadd.f32 %v658_v62, %v657_v61 }
  0x70   : > { %v660_v37 = vmul.f32 %v656_v0, %v656_v0  ;;  %v661_v2 = vmul.f32 %v659_v1, %v659_v1 }
  0x72   : > { %v662_v3 = vadd.f32 %v661_v2, %v660_v37 }
  0x74   : > { %v663_v4 = vadd.f32 1e-37, %v662_v3 }
  0x76   : > { %893 = vrsqrt.f32 %v663_v4 }
  0x83   : > { %v894_v5 = vpop.eup %893 }
  0x84   : > { %v665_v8 = vmul.f32 %v894_v5, %v656_v0  ;;  %v666_v9 = vmul.f32 %v894_v5, %v659_v1 }
  0x86   : > { %667 = vst [vmem:[#allocation2 - $0x7] sm:$0x80] %v665_v8  ;;  %668 = vst [vmem:[#allocation3 - $0x7] sm:$0x80] %v666_v9 }
  0x89   : > { %v583_v10 = vpop.permute.xlu1 %582  ;;  %v459_v11 = vpop.permute.xlu0 %458 }
  0x8a   : > { %v585_v14 = vmul.f32 %v583_v10, %v999_v39  ;;  %v461_v17 = vmul.f32 %v459_v11, %v1001_v43 }
  0x8d   : > { %v590_v16 = vpop.permute.xlu1 %589  ;;  %v466_v15 = vpop.permute.xlu0 %465 }
  0x8e   : > { %v592_v18 = vmul.f32 %v590_v16, %v1009_v58  ;;  %v468_v19 = vmul.f32 %v466_v15, %v1013_v63 }
  0x90   : > { %v593_v20 = vadd.f32 %v592_v18, %v585_v14  ;;  %v469_v21 = vadd.f32 %v468_v19, %v461_v17 }
  0x92   : > { %v648_v22 = vmul.f32 %v644_v56, %v593_v20  ;;  %v651_v23 = vmul.f32 %v647_v57, %v593_v20  ;;  %v531_v39 = vmul.f32 %v1056_v12, %v469_v21  ;;  %v533_v43 = vmul.f32 %v1058_v13, %v469_v21 }
  0x94   : > { %850 = vst [vmem:[%s396_s21 + $0x8] sm:$0xff] %v648_v22  ;;  %851 = vst [vmem:[%s404_s27 + $0x8] sm:$0xff] %v651_v23 }
  0x95   : > { %532 = vst [vmem:[%s396_s21] sm:$0xff] %v531_v39  ;;  %534 = vst [vmem:[%s404_s27] sm:$0xff] %v533_v43 }
  0x96 PF: > { %s17_s23 = sadd.s32 1, %s917_s23   ;;  %s1111_s21 = smov %s913_s22 }
  0x97   : > { %p14_p5 = scmp.ge.s32.totalorder %s17_s23, 10   ;;  %s1112_s22 = smov %s1114_s24 }
  0x99   :  { %16 = sbr.rel (!%p14_p5) target bundleno = 2 (0x2), region = 105 }

</bundles_post_ra>
